<compile_context>
chip_gen: v7x
topology: tpu7x:2x2x1
jax: 0.10.0
libtpu: 0.0.40
codegen_flags: <defaults>
</compile_context>

<pallas_src>
import re
import jax
import jax.numpy as jnp
from jax import lax
from jax.experimental import pallas as pl
from jax.experimental.pallas import tpu as pltpu


# ---------------------------------------------------------------------------
# Pallas kernel: one fused one-hot matmul + bias + exp + reparameterization
# ---------------------------------------------------------------------------
def _encoder_kernel(ids_ref, tbl_ref, bias_ref, eps_ref, out_ref):
    ids = ids_ref[...]                    # (N, 1) int32 token ids
    tbl = tbl_ref[...]                    # (V, 2L) bf16 (embedding+pool+heads fused)
    N = ids.shape[0]
    V = tbl.shape[0]
    L = eps_ref.shape[1]

    # one-hot gather of the fused table rows via the MXU (bf16 in, f32 acc)
    iota = lax.broadcasted_iota(jnp.int32, (N, V), 1)
    onehot = (iota == ids).astype(jnp.bfloat16)                       # (N, V)
    ms = jnp.dot(onehot, tbl, preferred_element_type=jnp.float32)     # (N, 2L)
    ms = ms + bias_ref[...]

    mean = ms[:, :L]
    std = jnp.exp(ms[:, L:])              # EUP transcendental
    z = mean + std * eps_ref[...]

    # single lane-packed output slab: [z | mean | std]  ->  (N, 3L)
    out_ref[...] = jnp.concatenate([z, mean, std], axis=1)


def instruction_encoder_forward(ids, fused_table, fused_bias, eps):
    """ids: (N,1) int32; fused_table: (V,2L) bf16; fused_bias: (1,2L) f32;
       eps: (N,L) f32.  Returns (z, mean, std), each (N, L) f32."""
    N = ids.shape[0]
    L = eps.shape[1]
    vmem = pl.BlockSpec(memory_space=pltpu.MemorySpace.VMEM)
    out = pl.pallas_call(
        _encoder_kernel,
        out_shape=jax.ShapeDtypeStruct((N, 3 * L), jnp.float32),
        in_specs=[vmem, vmem, vmem, vmem],
        out_specs=vmem,
    )(ids, fused_table, fused_bias, eps)
    return out[:, :L], out[:, L:2 * L], out[:, 2 * L:]


# ---------------------------------------------------------------------------
# Host-side algebraic fusion of embedding + AvgPool1d(2) + Gaussian heads
# ---------------------------------------------------------------------------
def _make_pool_mat(E):
    # AvgPool1d(kernel=2, stride=2) over the flattened (1,1,T*E) tensor is
    # exactly "average adjacent feature pairs of each token": (E, E//2) matrix.
    r = jnp.arange(E)[:, None]
    c = jnp.arange(E // 2)[None, :]
    return jnp.where((r // 2) == c, 0.5, 0.0).astype(jnp.float32)


def _fuse_params(table, w_mean, b_mean, w_logstd, b_logstd):
    E = table.shape[1]
    pool = _make_pool_mat(E)                                     # (E, E//2)
    w_cat = jnp.concatenate([w_mean, w_logstd], axis=1)          # (E//2, 2L)
    fused_table = (table @ pool @ w_cat).astype(jnp.bfloat16)    # (V, 2L)
    fused_bias = jnp.concatenate([b_mean, b_logstd], axis=1)     # (1, 2L)
    return fused_table, fused_bias


def _reference_forward(ids, table, w_mean, b_mean, w_logstd, b_logstd, eps):
    # pure-JAX, unfused f32 reference of the same forward pass
    emb = table[ids[:, 0]]                                       # (N, E)
    pooled = emb @ _make_pool_mat(table.shape[1])                # (N, E//2)
    mean = pooled @ w_mean + b_mean
    std = jnp.exp(pooled @ w_logstd + b_logstd)
    z = mean + std * eps
    return z, mean, std


# ---------------------------------------------------------------------------
# Host-side glue: tokenizer / vocab / deterministic parameter init
# ---------------------------------------------------------------------------
_VOCAB = ["<unk>", "move", "the", "red", "block", "to", "green", "target",
          "pick", "up", "blue", "cube", "place", "on", "yellow", "goal"]
_WORD2INDEX = {w: i for i, w in enumerate(_VOCAB)}


def _tokenize(text):
    text = re.sub(r"[^\w]", " ", text)
    return [t for t in text.lower().split() if t]


def _make_params(key, vocab_size, embedding_dim, latent_dim):
    k_emb, k_wm, k_bm, k_ws, k_bs = jax.random.split(key, 5)
    in_dim = embedding_dim // 2  # GaussianNetwork(embedding_dim/2, latent_dim)
    bound = 1.0 / jnp.sqrt(in_dim)
    table = jax.random.normal(k_emb, (vocab_size, embedding_dim), jnp.float32)
    w_mean = jax.random.uniform(k_wm, (in_dim, latent_dim), jnp.float32, -bound, bound)
    b_mean = jax.random.uniform(k_bm, (1, latent_dim), jnp.float32, -bound, bound)
    w_logstd = jax.random.uniform(k_ws, (in_dim, latent_dim), jnp.float32, -bound, bound)
    b_logstd = jax.random.uniform(k_bs, (1, latent_dim), jnp.float32, -bound, bound)
    return table, w_mean, b_mean, w_logstd, b_logstd


if __name__ == "__main__":
    latent_dim = 32
    embedding_dim = 8
    key = jax.random.PRNGKey(0)
    k_params, k_eps = jax.random.split(key)

    table, w_mean, b_mean, w_logstd, b_logstd = _make_params(
        k_params, len(_VOCAB), embedding_dim, latent_dim)
    fused_table, fused_bias = _fuse_params(
        table, w_mean, b_mean, w_logstd, b_logstd)

    # batch two instructions (8 tokens each) through one pallas_call
    texts = ["Move the red block to the green target!",
             "Pick up the blue cube on yellow goal"]
    tok_ids = [[_WORD2INDEX.get(w, 0) for w in _tokenize(t)] for t in texts]
    lengths = [len(t) for t in tok_ids]
    ids = jnp.asarray(sum(tok_ids, []), dtype=jnp.int32).reshape(-1, 1)   # (N, 1)
    N = ids.shape[0]                                                      # 16

    eps = jax.random.normal(k_eps, (N, latent_dim), jnp.float32)

    z, mean, std = instruction_encoder_forward(ids, fused_table, fused_bias, eps)
    jax.block_until_ready((z, mean, std))

    # split the batched token rows back into per-instruction (1, T, L) outputs
    per_text, start = [], 0
    for T in lengths:
        per_text.append((z[start:start + T][None],
                         mean[start:start + T][None],
                         std[start:start + T][None]))
        start += T

    # correctness checks vs. the unfused f32 reference (bf16 fused table)
    z_ref, mean_ref, std_ref = _reference_forward(
        ids, table, w_mean, b_mean, w_logstd, b_logstd, eps)
    assert per_text[0][0].shape == (1, lengths[0], latent_dim)
    assert per_text[1][1].shape == (1, lengths[1], latent_dim)
    assert bool(jnp.all(std > 0.0))
    assert bool(jnp.allclose(mean, mean_ref, rtol=1e-2, atol=1e-2))
    assert bool(jnp.allclose(std, std_ref, rtol=1e-2, atol=1e-2))
    assert bool(jnp.allclose(z, z_ref, rtol=1e-2, atol=1e-2))
    print("KERNEL_OK")
</pallas_src>

<mosaic_0001>
module attributes {stable_mosaic.version = 11 : i64} {
  func.func @_encoder_kernel(%arg0: memref<16x1xi32, #tpu.memory_space<vmem>>, %arg1: memref<16x64xbf16, #tpu.memory_space<vmem>>, %arg2: memref<1x64xf32, #tpu.memory_space<vmem>>, %arg3: memref<16x32xf32, #tpu.memory_space<vmem>>, %arg4: memref<16x96xf32, #tpu.memory_space<vmem>>) attributes {dimension_semantics = [], scalar_prefetch = 0 : i64, scratch_operands = 0 : i64, tpu.core_type = #tpu.core_type<tc>} {
    %c0 = arith.constant 0 : index
    %c0_0 = arith.constant 0 : index
    %0 = vector.load %arg0[%c0, %c0_0] : memref<16x1xi32, #tpu.memory_space<vmem>>, vector<16x1xi32>
    %c0_1 = arith.constant 0 : index
    %c0_2 = arith.constant 0 : index
    %1 = vector.load %arg1[%c0_1, %c0_2] : memref<16x64xbf16, #tpu.memory_space<vmem>>, vector<16x64xbf16>
    %2 = tpu.iota {dimensions = array<i32: 1>} : vector<16x16xi32>
    %3 = vector.broadcast %0 : vector<16x1xi32> to vector<16x16xi32>
    %4 = arith.cmpi eq, %2, %3 : vector<16x16xi32>
    %5 = arith.extui %4 : vector<16x16xi1> to vector<16x16xi32>
    %6 = arith.sitofp %5 : vector<16x16xi32> to vector<16x16xf32>
    %7 = arith.truncf %6 : vector<16x16xf32> to vector<16x16xbf16>
    %cst = arith.constant dense<0.000000e+00> : vector<16x64xf32>
    %8 = tpu.matmul %7, %1, %cst {dimension_numbers = #tpu.dot_dimension_numbers<[1], [0], [0], [1], [0, 0, 1, 1], [], []>} : vector<16x16xbf16>, vector<16x64xbf16>, vector<16x64xf32> -> vector<16x64xf32>
    %c0_3 = arith.constant 0 : index
    %c0_4 = arith.constant 0 : index
    %9 = vector.load %arg2[%c0_3, %c0_4] : memref<1x64xf32, #tpu.memory_space<vmem>>, vector<1x64xf32>
    %10 = vector.broadcast %9 : vector<1x64xf32> to vector<16x64xf32>
    %11 = arith.addf %8, %10 : vector<16x64xf32>
    %12 = vector.extract_strided_slice %11 {offsets = [0, 0], sizes = [16, 32], strides = [1, 1]} : vector<16x64xf32> to vector<16x32xf32>
    %13 = vector.extract_strided_slice %11 {offsets = [0, 32], sizes = [16, 32], strides = [1, 1]} : vector<16x64xf32> to vector<16x32xf32>
    %14 = math.exp %13 : vector<16x32xf32>
    %c0_5 = arith.constant 0 : index
    %c0_6 = arith.constant 0 : index
    %15 = vector.load %arg3[%c0_5, %c0_6] : memref<16x32xf32, #tpu.memory_space<vmem>>, vector<16x32xf32>
    %16 = arith.mulf %14, %15 : vector<16x32xf32>
    %17 = arith.addf %12, %16 : vector<16x32xf32>
    %18 = tpu.concatenate %17, %12, %14 in 1 : vector<16x32xf32>, vector<16x32xf32>, vector<16x32xf32> -> vector<16x96xf32>
    %c0_7 = arith.constant 0 : index
    %c0_8 = arith.constant 0 : index
    %19 = vector.load %arg4[%c0_7, %c0_8] : memref<16x96xf32, #tpu.memory_space<vmem>>, vector<16x96xf32>
    tpu.vector_store %arg4[%c0_7, %c0_8], %18 {strides = array<i32>} : memref<16x96xf32, #tpu.memory_space<vmem>>, vector<16x96xf32>,
    return
  }
}

</mosaic_0001>

<bundles_post_ra>
// kernel: tpu_custom_call.1
= control target key start
LH: loop header
LB: loop body
LE: loop exit
PB: predicated region body
PF: predicated region fallthrough
CT: control target
= control target key end

     0   :  { %v214_v1 = vmov 0   ;;  %v215_v2 = vmov 0.0   ;;  %s283_s0 = inlined_call_operand.vmem [shape: s32[16,1], index: 0, kind: input, shape index: {}]   ;;  %s284_s1 = inlined_call_operand.vmem [shape: bf16[16,64], index: 1, kind: input, shape index: {}]   ;;  %s285_s2 = inlined_call_operand.vmem [shape: f32[1,64], index: 2, kind: input, shape index: {}]   ;;  %s286_s3 = inlined_call_operand.vmem [shape: f32[16,32], index: 3, kind: input, shape index: {}]   ;;  %s287_s4 = inlined_call_operand.hbm [shape: f32[16,96], index: 4, kind: output, shape index: {}]  }
   0x1   :  { %v19_v0 = vld [vmem:[%s283_s0] sm:$0xff]  ;;  %184 = vset.pattern.permute.xlu0 %v214_v1  ;;  %170 = vmatprep.subr.bf16.mxu0 %v215_v2 }
   0x2   :  { %9 = vsyncpa [#allocation3], 0  ;;  %26 = vperm.xlu0 %184, %v19_v0   ;;  %v20_v3 = vld [vmem:[%s283_s0 + $0x8] sm:$0xff]  ;;  %v185_v4 = vld [vmem:[%s284_s1] sm:$0xff]   ;;  %vm216_vm0 = vmmov 0   ;;  %s217_s23 = smov 32   ;;  %v23_v7 = vlaneseq }
   0x3   :  { %171 = vmatpush3.bf16.msra.mxu0 %v185_v4  ;;  %172 = vmatprep.mubr.msk.bf16.mxu0 %vm216_vm0, %v215_v2  ;;  %v100_v5 = vld [vmem:[%s286_s3] sm:$0xff]  ;;  %v101_v6 = vld [vmem:[%s286_s3 + $0x8] sm:$0xff]  ;;  %vm51_vm3 = vcmask 130048   ;;  %vm138_vm4 = vcmask 261120   ;;  %vm141_vm5 = vcmask 523264   ;;  %s219_s3 = smov [#allocation2]  }
   0x4   :  { %104 = vrot.lane.b32.xlu1 %v100_v5, %s217_s23  ;;  %v24_v8 = vand.u32 127, %v23_v7  ;;  %v165_v14 = vld [vmem:[%s285_s2] ss:$0 sm:$0xff]  ;;  %s218_s2 = smov 96   ;;  %s152_s26 = sshll.u32 %s219_s3, 4  ;;  %vm144_vm6 = vcmask 785408   ;;  %s153_s26 = int_to_ptr.vmem [resolvable:$true] %s152_s26 }
   0x5   :  { %s190_s27 = scalar_lea.vmem %s153_s26, 256  ;;  %p195_p1 = scmp.lt.s32.totalorder %s153_s26, %s153_s26 }
   0x6   :  { %29 = vperm.xlu0 %184, %v20_v3   ;;  %p191_p0 = scmp.ne.s32.totalorder %s153_s26, %s190_s27  ;;  %p196_p2 = scmp.lt.s32.totalorder %s190_s27, %s190_s27 }
   0x8   :  { %106 = vrot.lane.b32.xlu1 %v101_v6, %s217_s23  ;;  %p197_p3 = por %p196_p2, %p195_p1 }
   0xa   :  { %p198_p4 = pnand %p197_p3, %p191_p0 }
  0x76   :  { %v105_v23 = vpop.permute.xlu1 %104 }
  0x7a   :  { %v107_v25 = vpop.permute.xlu1 %106 }
  0x81   :  { %v27_v9 = vpop.permute.xlu0 %26 }
  0x82   :  { %vm31_vm1 = vcmp.eq.s32.totalorder %v24_v8, %v27_v9 }
  0x83   :  { %v163_v11 = vsel %vm31_vm1, 1.0, %v215_v2 }
  0x85   :  { %v30_v10 = vpop.permute.xlu0 %29 }
  0x86   :  { %vm32_vm2 = vcmp.eq.s32.totalorder %v24_v8, %v30_v10 }
  0x87   :  { %v164_v12 = vsel %vm32_vm2, 1.0, %v215_v2 }
  0x88   :  { %v37_v13 = vpack.c.bf16 %v164_v12, %v163_v11 }
  0x8a   :  { %173 = vmatmul.mubr.msk.bf16.vlgmr.msra.gmra.mrb[0].mxu0 %vm51_vm3, %v37_v13 }
 0x15d   :  { %v89_v15 = vpop.f32.mrb[0].mxu0 }
 0x15e   :  { %v90_v16 = vadd.f32 %v165_v14, %v89_v15  ;;  %v174_v17 = vpop.f32.mrb[1].mxu0 }
 0x15f   :  { %v92_v18 = vpop.f32.mrb[2].mxu0 }
 0x160   :  { %v96_v19 = vmul.f32 1.442695, %v90_v16  ;;  %v93_v20 = vadd.f32 %v165_v14, %v92_v18  ;;  %124 = vrot.lane.b32.xlu0 %v90_v16, %s217_s23  ;;  %v175_v21 = vpop.f32.mrb[3].mxu0 }
 0x162   :  { %186 = vpow2.f32 %v96_v19  ;;  %v98_v22 = vmul.f32 1.442695, %v93_v20  ;;  %126 = vrot.lane.b32.xlu1 %v93_v20, %s217_s23 }
 0x164   :  { %188 = vpow2.f32 %v98_v22 }
 0x16c   :  { %v187_v24 = vpop.eup %186 }
 0x16d   :  { %v110_v26 = vmul.f32 %v187_v24, %v105_v23 }
 0x16e   :  { %v189_v27 = vpop.eup %188 }
 0x16f   :  { %v111_v28 = vmul.f32 %v189_v27, %v107_v25  ;;  %114 = vrot.lane.b32.xlu0 %v110_v26, %s218_s2 }
 0x171   :  { %116 = vrot.lane.b32.xlu1 %v111_v28, %s218_s2 }
 0x173   :  { %132 = vrot.lane.b32.xlu0 %v187_v24, %s217_s23 }
 0x175   :  { %134 = vrot.lane.b32.xlu1 %v189_v27, %s217_s23 }
 0x1d2   :  { %v125_v29 = vpop.permute.xlu0 %124 }
 0x1d4   :  { %v127_v30 = vpop.permute.xlu1 %126 }
 0x1e1   :  { %v115_v31 = vpop.permute.xlu0 %114 }
 0x1e2   :  { %v120_v32 = vadd.f32 %v115_v31, %v90_v16 }
 0x1e3   :  { %v117_v33 = vpop.permute.xlu1 %116 }
 0x1e4   :  { %v121_v34 = vadd.f32 %v117_v33, %v93_v20  ;;  %v139_v35 = vsel %vm138_vm4, %v120_v32, %v125_v29 }
 0x1e5   :  { %v133_v36 = vpop.permute.xlu0 %132 }
 0x1e6   :  { %v142_v37 = vsel %vm141_vm5, %v139_v35, %v133_v36  ;;  %v140_v38 = vsel %vm138_vm4, %v121_v34, %v127_v30 }
 0x1e7   :  { %145 = vst.msk [vmem:[#allocation2] sm:$0xff] %vm144_vm6, %v142_v37  ;;  %v135_v39 = vpop.permute.xlu1 %134 }
 0x1e8   :  { %v143_v40 = vsel %vm141_vm5, %v140_v38, %v135_v39 }
 0x1e9   :  { %146 = vst.msk [vmem:[#allocation2 + $0x8] sm:$0xff] %vm144_vm6, %v143_v40 }
 0x1ea   :  { %201 = shalt.err (!%p198_p4)
}
 0x1eb   :  { %s202_s30 = scalar_lea.hbm %s287_s4, 256 }
 0x1ec   :  { %p203_p5 = scmp.ne.s32.totalorder %s287_s4, %s202_s30  ;;  %p206_p6 = scmp.lt.u32.totalorder %s202_s30, %s287_s4 }
 0x1ee   :  { %p208_p7 = pnand %p206_p6, %p203_p5 }
 0x1f0   :  { %211 = shalt.err (!%p208_p7)
}
 0x1f1   :  { %s220_s9 = smov 128   ;;  %s221_s10 = smov 8  }
 0x1f2   :  { %158 = dma.vmem_to_hbm [thread:$0]  %s153_s26, 256, %s287_s4, [#allocation3], %s220_s9, %s220_s9, %s221_s10  }
 0x1f3   :  { %212 = dma.done.wait [#allocation3], 256  }
 0x1f4   :  { %213 = vsyncadd [#allocation3], 4294967040 }
 0x1f5   :  { %162 = vsyncpa [#allocation3], 1 }

</bundles_post_ra>
